<compile_context>
chip_gen: v5e
topology: v5e:2x2
jax: 0.10.0
libtpu: 0.0.40
codegen_flags: <defaults>
</compile_context>

<pallas_src>
import jax
import jax.numpy as jnp
from jax.experimental import pallas as pl
from jax.experimental.pallas import tpu as pltpu

_LANE = 128


def _sigmoid(x):
    # exp runs on the EUP slot; exact reciprocal (kernel is nowhere near
    # compute-bound, so the extra Newton steps are free) keeps the result
    # close to the f32 PyTorch reference.
    return pl.reciprocal(1.0 + jnp.exp(-x), approx=False)


def discriminator_kernel(x_ref, w1_ref, b1_ref, w2_ref, b2_ref, o_ref):
    # x_ref : (tile, d_in)     f32
    # w1_ref: (d_in, d_hidden) f32
    # b1_ref: (1, d_hidden)    f32
    # w2_ref: (1, d_hidden)    f32   (PyTorch lin2.weight layout)
    # b2_ref: (1,)             f32   (SMEM scalar)
    # o_ref : (1, 1, tile)     f32   (lane-dense: batch along lanes)
    h = jnp.dot(x_ref[...], w1_ref[...], preferred_element_type=jnp.float32)
    h = _sigmoid(h + b1_ref[...])                       # (tile, d_hidden) f32

    # Second layer: contract the hidden axis of both operands so the result is
    # (1, tile) -- batch lands on the lane axis (lane-dense, unmasked stores)
    # and the MXU sees an M=1, N=tile matmul instead of a wasteful N=1 one.
    logits = jax.lax.dot_general(
        w2_ref[...], h,
        dimension_numbers=(((1,), (1,)), ((), ())),
        preferred_element_type=jnp.float32,
    ) + b2_ref[0]                                       # (1, tile) f32
    o_ref[0] = _sigmoid(logits).astype(o_ref.dtype)


def _round_up(n, m):
    return ((n + m - 1) // m) * m


def _vmem_capacity_bytes():
    """Physical VMEM of the current chip; conservative v7x fallback."""
    try:
        info = pltpu.get_tpu_info()
        cap = getattr(info, "vmem_capacity_bytes", None)
        if cap:
            return int(cap)
    except Exception:
        pass
    return 64 * 1024 * 1024  # v7x physical VMEM (smallest of v5e/v6e/v7x)


def _num_tensorcores():
    """TensorCores per device; 1 if unknown (safe: just skips the split)."""
    try:
        dev = jax.devices()[0]
        for attr in ("num_cores", "core_count"):
            v = getattr(dev, attr, None)
            if isinstance(v, int) and v > 0:
                return int(v)
    except Exception:
        pass
    return 1


def discriminator_forward(x, w1, b1, w2, b2, *, batch_tile=4096):
    """sigmoid(sigmoid(x @ w1 + b1) @ w2.T + b2), returns (B, 1) float32.

    x : (B, d_in); w1: (d_in, d_hidden); b1: (d_hidden,) or (1, d_hidden);
    w2: (1, d_hidden) (PyTorch lin2.weight layout); b2: scalar / (1,).
    """
    B, d_in = x.shape
    d_hidden = w1.shape[1]

    # ---- generation-aware VMEM budget --------------------------------------
    cap = _vmem_capacity_bytes()
    vmem_limit = max(16 * 2**20, min(100 * 2**20, int(cap * 0.70)))
    budget = vmem_limit - 4 * 2**20          # headroom for Mosaic scratch

    d_in_lane = _round_up(d_in, _LANE)       # lane padding of x tile
    d_in_sub = _round_up(d_in, 8)            # sublane padding of w1
    d_h_lane = _round_up(d_hidden, _LANE)    # lane padding of w1/b1/w2/h

    def vmem_bytes(t):
        return (2 * t * d_in_lane * 4        # x tile (f32), double-buffered
                + 2 * 8 * t * 4              # (1,1,t) out block, double-buffered
                + 2 * d_in_sub * d_h_lane * 4  # w1 (double-buffered copies)
                + 4 * 8 * d_h_lane * 4       # b1 + w2 (double-buffered)
                + t * d_h_lane * 4           # h intermediate (f32)
                + 2 * 8 * t * 4              # logits / temporaries
                + (1 << 20))                 # slack

    # ---- batch tiling -------------------------------------------------------
    # tile is a multiple of 128 so the lane-dense output block is >=128 wide
    # (unmasked vst) and the x block satisfies the sublane constraint.
    tile = max(_LANE, min(_round_up(int(batch_tile), _LANE), _round_up(B, _LANE)))

    # Only split work on multi-TensorCore parts (v7x): aim for >=2 steps per
    # core so the per-core pipeline has DMA/compute overlap.  On single-TC
    # chips (v5e/v6e) extra steps are pure per-step overhead.
    num_tc = _num_tensorcores()
    if num_tc > 1 and B > _LANE:
        per_core_tile = _round_up(pl.cdiv(B, 2 * num_tc), _LANE)
        tile = max(_LANE, min(tile, per_core_tile))

    while tile > _LANE and vmem_bytes(tile) > budget:
        tile = _round_up(tile // 2, _LANE)

    grid = pl.cdiv(B, tile)
    B_pad = grid * tile

    # ---- parameter plumbing (all f32; x passed through untouched) ----------
    x_f32 = jnp.asarray(x, jnp.float32)
    w1_f32 = jnp.asarray(w1, jnp.float32)
    b1_f32 = jnp.asarray(b1, jnp.float32).reshape(1, d_hidden)
    w2_f32 = jnp.asarray(w2, jnp.float32).reshape(1, d_hidden)
    b2_f32 = jnp.asarray(b2, jnp.float32).reshape(1)

    out3d = pl.pallas_call(
        discriminator_kernel,
        out_shape=jax.ShapeDtypeStruct((grid, 1, tile), jnp.float32),
        grid_spec=pltpu.PrefetchScalarGridSpec(
            num_scalar_prefetch=0,
            grid=(grid,),
            in_specs=[
                pl.BlockSpec((tile, d_in), lambda i: (i, 0)),        # x (ragged last block OK)
                pl.BlockSpec((d_in, d_hidden), lambda i: (0, 0)),    # w1
                pl.BlockSpec((1, d_hidden), lambda i: (0, 0)),       # b1
                pl.BlockSpec((1, d_hidden), lambda i: (0, 0)),       # w2
                pl.BlockSpec(memory_space=pltpu.MemorySpace.SMEM),   # b2 scalar
            ],
            out_specs=pl.BlockSpec((1, 1, tile), lambda i: (i, 0, 0)),
        ),
        compiler_params=pltpu.CompilerParams(
            dimension_semantics=("parallel",),
            vmem_limit_bytes=vmem_limit,
        ),
    )(x_f32, w1_f32, b1_f32, w2_f32, b2_f32)

    # (grid, 1, tile) -> (B, 1): batch order is preserved; padded rows dropped.
    return out3d.reshape(B_pad, 1)[:B]


def init_params(key, input_size, layer_size=64):
    """Deterministic init mimicking nn.Linear's U(-1/sqrt(fan_in), 1/sqrt(fan_in))."""
    k1, k2, k3, k4 = jax.random.split(key, 4)
    bound1 = 1.0 / jnp.sqrt(jnp.float32(input_size))
    bound2 = 1.0 / jnp.sqrt(jnp.float32(layer_size))
    w1 = jax.random.uniform(k1, (input_size, layer_size), jnp.float32, -bound1, bound1)
    b1 = jax.random.uniform(k2, (layer_size,), jnp.float32, -bound1, bound1)
    w2 = jax.random.uniform(k3, (1, layer_size), jnp.float32, -bound2, bound2)
    b2 = jax.random.uniform(k4, (1,), jnp.float32, -bound2, bound2)
    return w1, b1, w2, b2


if __name__ == "__main__":
    key = jax.random.PRNGKey(0)
    kx, kp = jax.random.split(key)

    batch = 64
    input_size = 32
    layer_size = 64

    x = jax.random.normal(kx, (batch, input_size), jnp.float32)
    w1, b1, w2, b2 = init_params(kp, input_size, layer_size)

    out = discriminator_forward(x, w1, b1, w2, b2)
    out = jax.block_until_ready(out)

    # Pure-JAX f32 reference (matches the PyTorch module's math).
    hp = jax.lax.Precision.HIGHEST
    h_ref = jax.nn.sigmoid(jnp.dot(x, w1, precision=hp) + b1[None, :])
    ref = jax.nn.sigmoid(jnp.dot(h_ref, w2.T, precision=hp) + b2)

    assert out.shape == (batch, 1), out.shape
    max_err = float(jnp.max(jnp.abs(out - ref)))
    assert jnp.allclose(out, ref, atol=5e-3), max_err

    print("KERNEL_OK")
</pallas_src>

<mosaic_0001>
module attributes {stable_mosaic.version = 11 : i64} {
  func.func @discriminator_kernel(%arg0: i32, %arg1: memref<128x32xf32, #tpu.memory_space<vmem>>, %arg2: memref<32x64xf32, #tpu.memory_space<vmem>>, %arg3: memref<1x64xf32, #tpu.memory_space<vmem>>, %arg4: memref<1x64xf32, #tpu.memory_space<vmem>>, %arg5: memref<1xf32, #tpu.memory_space<smem>>, %arg6: memref<1x1x128xf32, #tpu.memory_space<vmem>>) attributes {dimension_semantics = [#tpu.dimension_semantics<parallel>], iteration_bounds = array<i64: 1>, scalar_prefetch = 0 : i64, scratch_operands = 0 : i64, tpu.core_type = #tpu.core_type<tc>, window_params = [{transform_indices = @transform_0, window_bounds = array<i64: 128, 32>}, {pipeline_mode = #tpu.pipeline_mode<synchronous>, transform_indices = @transform_1, window_bounds = array<i64: 32, 64>}, {pipeline_mode = #tpu.pipeline_mode<synchronous>, transform_indices = @transform_2, window_bounds = array<i64: 1, 64>}, {pipeline_mode = #tpu.pipeline_mode<synchronous>, transform_indices = @transform_3, window_bounds = array<i64: 1, 64>}, {transform_indices = @transform_4, window_bounds = array<i64: 1>}, {transform_indices = @transform_5, window_bounds = array<i64: 1, 1, 128>}]} {
    %c0 = arith.constant 0 : index
    %c0_0 = arith.constant 0 : index
    %0 = vector.load %arg1[%c0, %c0_0] : memref<128x32xf32, #tpu.memory_space<vmem>>, vector<128x32xf32>
    %c0_1 = arith.constant 0 : index
    %c0_2 = arith.constant 0 : index
    %1 = vector.load %arg2[%c0_1, %c0_2] : memref<32x64xf32, #tpu.memory_space<vmem>>, vector<32x64xf32>
    %cst = arith.constant dense<0.000000e+00> : vector<128x64xf32>
    %2 = tpu.matmul %0, %1, %cst {dimension_numbers = #tpu.dot_dimension_numbers<[1], [0], [0], [1], [0, 0, 1, 1], [], []>} : vector<128x32xf32>, vector<32x64xf32>, vector<128x64xf32> -> vector<128x64xf32>
    %c0_3 = arith.constant 0 : index
    %c0_4 = arith.constant 0 : index
    %3 = vector.load %arg3[%c0_3, %c0_4] : memref<1x64xf32, #tpu.memory_space<vmem>>, vector<1x64xf32>
    %4 = vector.broadcast %3 : vector<1x64xf32> to vector<128x64xf32>
    %5 = arith.addf %2, %4 : vector<128x64xf32>
    %cst_5 = arith.constant 0.000000e+00 : f32
    %6 = vector.broadcast %cst_5 : f32 to vector<128x64xf32>
    %7 = arith.subf %6, %5 : vector<128x64xf32>
    %8 = math.exp %7 : vector<128x64xf32>
    %cst_6 = arith.constant 1.000000e+00 : f32
    %9 = vector.broadcast %cst_6 : f32 to vector<128x64xf32>
    %10 = arith.addf %9, %8 : vector<128x64xf32>
    %11 = tpu.reciprocal %10 : vector<128x64xf32> -> vector<128x64xf32>
    %c0_7 = arith.constant 0 : index
    %c0_8 = arith.constant 0 : index
    %12 = vector.load %arg4[%c0_7, %c0_8] : memref<1x64xf32, #tpu.memory_space<vmem>>, vector<1x64xf32>
    %cst_9 = arith.constant dense<0.000000e+00> : vector<1x128xf32>
    %13 = tpu.matmul %12, %11, %cst_9 {dimension_numbers = #tpu.dot_dimension_numbers<[1], [1], [0], [0], [0, 0, 1, 0], [], []>} : vector<1x64xf32>, vector<128x64xf32>, vector<1x128xf32> -> vector<1x128xf32>
    %c0_10 = arith.constant 0 : index
    %14 = memref.load %arg5[%c0_10] : memref<1xf32, #tpu.memory_space<smem>>
    %15 = vector.broadcast %14 : f32 to vector<1x128xf32>
    %16 = arith.addf %13, %15 : vector<1x128xf32>
    %cst_11 = arith.constant 0.000000e+00 : f32
    %17 = vector.broadcast %cst_11 : f32 to vector<1x128xf32>
    %18 = arith.subf %17, %16 : vector<1x128xf32>
    %19 = math.exp %18 : vector<1x128xf32>
    %cst_12 = arith.constant 1.000000e+00 : f32
    %20 = vector.broadcast %cst_12 : f32 to vector<1x128xf32>
    %21 = arith.addf %20, %19 : vector<1x128xf32>
    %22 = tpu.reciprocal %21 : vector<1x128xf32> -> vector<1x128xf32>
    %c0_13 = arith.constant 0 : index
    %c0_14 = arith.constant 0 : index
    %c0_15 = arith.constant 0 : index
    %23 = vector.load %arg6[%c0_13, %c0_14, %c0_15] : memref<1x1x128xf32, #tpu.memory_space<vmem>>, vector<1x1x128xf32>
    %24 = vector.shape_cast %23 : vector<1x1x128xf32> to vector<1x128xf32>
    %25 = vector.shape_cast %22 : vector<1x128xf32> to vector<1x1x128xf32>
    tpu.vector_store %arg6[%c0_13, %c0_14, %c0_15], %25 {strides = array<i32>} : memref<1x1x128xf32, #tpu.memory_space<vmem>>, vector<1x1x128xf32>,
    return
  }
  func.func @transform_0(%arg0: i32) -> (i32, i32) {
    %c0_i32 = arith.constant 0 : i32
    %c0_i32_0 = arith.constant 0 : i32
    return %arg0, %c0_i32 : i32, i32
  }
  func.func @transform_1(%arg0: i32) -> (i32, i32) {
    %c0_i32 = arith.constant 0 : i32
    %c0_i32_0 = arith.constant 0 : i32
    %c0_i32_1 = arith.constant 0 : i32
    return %c0_i32, %c0_i32_0 : i32, i32
  }
  func.func @transform_2(%arg0: i32) -> (i32, i32) {
    %c0_i32 = arith.constant 0 : i32
    %c0_i32_0 = arith.constant 0 : i32
    %c0_i32_1 = arith.constant 0 : i32
    return %c0_i32, %c0_i32_0 : i32, i32
  }
  func.func @transform_3(%arg0: i32) -> (i32, i32) {
    %c0_i32 = arith.constant 0 : i32
    %c0_i32_0 = arith.constant 0 : i32
    %c0_i32_1 = arith.constant 0 : i32
    return %c0_i32, %c0_i32_0 : i32, i32
  }
  func.func @transform_4(%arg0: i32) -> i32 {
    %c0_i32 = arith.constant 0 : i32
    %c0_i32_0 = arith.constant 0 : i32
    return %c0_i32 : i32
  }
  func.func @transform_5(%arg0: i32) -> (i32, i32, i32) {
    %c0_i32 = arith.constant 0 : i32
    %c0_i32_0 = arith.constant 0 : i32
    %c0_i32_1 = arith.constant 0 : i32
    return %arg0, %c0_i32, %c0_i32_0 : i32, i32, i32
  }
}

</mosaic_0001>

<bundles_post_ra>
// kernel: tpu_custom_call.1
= control target key start
LH: loop header
LB: loop body
LE: loop exit
PB: predicated region body
PF: predicated region fallthrough
CT: control target
= control target key end

     0   :  { %vm46_vm0 = vcmask 261120   ;;  %s1152_s0 = inlined_call_operand.vmem [shape: f32[64,32], index: 0, kind: input, shape index: {}]   ;;  %s1153_s1 = inlined_call_operand.vmem [shape: f32[32,64], index: 1, kind: input, shape index: {}]   ;;  %s1154_s2 = inlined_call_operand.vmem [shape: f32[1,64], index: 2, kind: input, shape index: {}]   ;;  %s1155_s3 = inlined_call_operand.vmem [shape: f32[1,64], index: 3, kind: input, shape index: {}]   ;;  %s1156_s4 = inlined_call_operand.<no memory space> [shape: f32[1], index: 4, kind: input, shape index: {}]   ;;  %s1157_s5 = inlined_call_operand.hbm [shape: f32[1,1,128], index: 5, kind: output, shape index: {}]  }
   0x1   :  { %v41_v0 = vld [vmem:[%s1153_s1 + $0x18] sm:$0xff]  ;;  %v40_v1 = vld [vmem:[%s1153_s1 + $0x10] sm:$0xff]  ;;  %v39_v2 = vld [vmem:[%s1153_s1 + $0x8] sm:$0xff] }
   0x2   :  { %591 = vmatpush.msra.mxu2 %v41_v0  ;;  %592 = vmatpush.msra.mxu3 %v41_v0  ;;  %v38_v3 = vld [vmem:[%s1153_s1] sm:$0xff]  ;;  %v28_v4 = vld [vmem:[%s1152_s0 + $0x30] sm:$0xff] }
   0x3   :  { %107 = vmatpush.msra.mxu0 %v41_v0  ;;  %v34_v5 = vld [vmem:[%s1152_s0 + $0x60] sm:$0xff] }
   0x4   :  { %593 = vmatpush.msra.mxu2 %v40_v1  ;;  %594 = vmatpush.msra.mxu3 %v40_v1 }
   0x5   :  { %108 = vmatpush.msra.mxu0 %v40_v1 }
   0x6   :  { %595 = vmatpush.msra.mxu2 %v39_v2  ;;  %596 = vmatpush.msra.mxu3 %v39_v2 }
   0x7   :  { %11 = vsyncpa [#allocation4], 0  ;;  %109 = vmatpush.msra.mxu0 %v39_v2  ;;  %v22_v6 = vld [vmem:[%s1152_s0] sm:$0xff]  ;;  %v29_v7 = vld [vmem:[%s1152_s0 + $0x38] sm:$0xff]  ;;  %vm451_vm1 = vcmask 523264  }
   0x8   :  { %597 = vmatpush.msra.mxu2 %v38_v3  ;;  %598 = vmatpush.msra.mxu3 %v38_v3  ;;  %v35_v8 = vld [vmem:[%s1152_s0 + $0x68] sm:$0xff]  ;;  %v30_v10 = vld [vmem:[%s1152_s0 + $0x40] sm:$0xff]  ;;  %v36_v11 = vld [vmem:[%s1152_s0 + $0x70] sm:$0xff] }
   0x9   :  { %564 = vmatmul.msk.f32.vlgmr.msra.gmra.mxu2 %vm46_vm0, %v28_v4  ;;  %570 = vmatmul.msk.f32.vlgmr.msra.gmra.mxu3 %vm46_vm0, %v34_v5  ;;  %v23_v9 = vld [vmem:[%s1152_s0 + $0x8] sm:$0xff]  ;;  %v24_v12 = vld [vmem:[%s1152_s0 + $0x10] sm:$0xff]  ;;  %v37_v14 = vld [vmem:[%s1152_s0 + $0x78] sm:$0xff] }
   0xa   :  { %110 = vmatpush.msra.mxu0 %v38_v3  ;;  %v31_v13 = vld [vmem:[%s1152_s0 + $0x48] sm:$0xff]  ;;  %v25_v15 = vld [vmem:[%s1152_s0 + $0x18] sm:$0xff]  ;;  %v32_v16 = vld [vmem:[%s1152_s0 + $0x50] sm:$0xff] }
   0xb   :  { %558 = vmatmul.msk.f32.vlgmr.msra.gmra.mxu0 %vm46_vm0, %v22_v6  ;;  %v26_v17 = vld [vmem:[%s1152_s0 + $0x20] sm:$0xff]  ;;  %v33_v18 = vld [vmem:[%s1152_s0 + $0x58] sm:$0xff]  ;;  %v27_v19 = vld [vmem:[%s1152_s0 + $0x28] sm:$0xff] }
   0xc   :  { %v807_v24 = vld [vmem:[%s1154_s2] ss:$0 sm:$0xff] }
  0x11   :  { %565 = vmatmul.msk.f32.gmra.mxu2 %vm46_vm0, %v29_v7  ;;  %571 = vmatmul.msk.f32.gmra.mxu3 %vm46_vm0, %v35_v8 }
  0x13   :  { %559 = vmatmul.msk.f32.gmra.mxu0 %vm46_vm0, %v23_v9 }
  0x19   :  { %566 = vmatmul.msk.f32.gmra.mxu2 %vm46_vm0, %v30_v10  ;;  %572 = vmatmul.msk.f32.gmra.mxu3 %vm46_vm0, %v36_v11 }
  0x1b   :  { %560 = vmatmul.msk.f32.gmra.mxu0 %vm46_vm0, %v24_v12 }
  0x21   :  { %567 = vmatmul.msk.f32.gmra.mxu2 %vm46_vm0, %v31_v13  ;;  %573 = vmatmul.msk.f32.gmra.mxu3 %vm46_vm0, %v37_v14 }
  0x23   :  { %561 = vmatmul.msk.f32.gmra.mxu0 %vm46_vm0, %v25_v15 }
  0x29   :  { %568 = vmatmul.msk.f32.gmra.mxu2 %vm46_vm0, %v32_v16 }
  0x2b   :  { %562 = vmatmul.msk.f32.gmra.mxu0 %vm46_vm0, %v26_v17 }
  0x31   :  { %569 = vmatmul.msk.f32.gmra.mxu2 %vm46_vm0, %v33_v18 }
  0x33   :  { %563 = vmatmul.msk.f32.gmra.mxu0 %vm46_vm0, %v27_v19 }
  0x88   :  { %v802_v20 = vpop.f32.mrf.mxu0 }
  0x8c   :  { %v130_v21 = vpop.f32.mrf.mxu2  ;;  %v148_v22 = vpop.f32.mrf.mxu3 }
  0x8d   :  { %v149_v27 = vadd.f32 %v807_v24, %v148_v22  ;;  %v131_v40 = vadd.f32 %v807_v24, %v130_v21 }
  0x8f   :  { %v172_v30 = vsub.f32 0.0, %v149_v27  ;;  %v166_v47 = vsub.f32 0.0, %v131_v40 }
  0x90   :  { %v115_v23 = vpop.f32.mrf.mxu0 }
  0x91   :  { %v200_v35 = vmul.f32 1.442695, %v172_v30  ;;  %v188_v55 = vmul.f32 1.442695, %v166_v47  ;;  %v116_v6 = vadd.f32 %v807_v24, %v115_v23 }
  0x93   :  { %601 = vpow2.f32 %v200_v35  ;;  %v161_v18 = vsub.f32 0.0, %v116_v6 }
  0x94   :  { %v133_v25 = vpop.f32.mrf.mxu2  ;;  %v151_v26 = vpop.f32.mrf.mxu3 }
  0x95   :  { %v152_v28 = vadd.f32 %v807_v24, %v151_v26  ;;  %v134_v48 = vadd.f32 %v807_v24, %v133_v25  ;;  %v857_v35 = vmul.f32 1.442695, %v161_v18 }
  0x97   :  { %v173_v31 = vsub.f32 0.0, %v152_v28  ;;  %v167_v56 = vsub.f32 0.0, %v134_v48 }
  0x98   :  { %v118_v29 = vpop.f32.mrf.mxu0 }
  0x99   :  { %v202_v37 = vmul.f32 1.442695, %v173_v31  ;;  %v602_v46 = vpop.eup %601  ;;  %v190_v1 = vmul.f32 1.442695, %v167_v56  ;;  %v119_v10 = vadd.f32 %v807_v24, %v118_v29 }
  0x9a   :  { %v819_v54 = vadd.f32 1.0, %v602_v46 }
  0x9b   :  { %603 = vpow2.f32 %v202_v37  ;;  %v162_v22 = vsub.f32 0.0, %v119_v10 }
  0x9c   :  { %v136_v32 = vpop.f32.mrf.mxu2  ;;  %v154_v33 = vpop.f32.mrf.mxu3  ;;  %v403_v6 = vand.u32 2147483648, %v819_v54  ;;  %vm397_vm14 = vweird.f32 %v819_v54 }
  0x9d   :  { %v155_v34 = vadd.f32 %v807_v24, %v154_v33  ;;  %v137_v49 = vadd.f32 %v807_v24, %v136_v32  ;;  %v863_v40 = vmul.f32 1.442695, %v162_v22 }
  0x9f   :  { %v174_v36 = vsub.f32 0.0, %v155_v34  ;;  %v168_v61 = vsub.f32 0.0, %v137_v49  ;;  %v855_v34 = vadd.f32 %v807_v24, %v802_v20 }
  0xa0   :  { %v812_v39 = vpop.f32.mrf.mxu0 }
  0xa1   :  { %v204_v38 = vmul.f32 1.442695, %v174_v36  ;;  %v604_v51 = vpop.eup %603  ;;  %v192_v2 = vmul.f32 1.442695, %v168_v61  ;;  %v122_v31 = vadd.f32 %v807_v24, %v812_v39 }
  0xa2   :  { %v823_v60 = vadd.f32 1.0, %v604_v51 }
  0xa3   :  { %605 = vpow2.f32 %v204_v38 }
  0xa4   :  { %v139_v41 = vpop.f32.mrf.mxu2  ;;  %v157_v42 = vpop.f32.mrf.mxu3  ;;  %vm411_vm12 = vweird.f32 %v823_v60 }
  0xa5   :  { %v158_v43 = vadd.f32 %v807_v24, %v157_v42  ;;  %v140_v44 = vadd.f32 %v807_v24, %v139_v41 }
  0xa7   :  { %v175_v45 = vsub.f32 0.0, %v158_v43  ;;  %v169_v52 = vsub.f32 0.0, %v140_v44 }
  0xa8   :  { %v124_v59 = vpop.f32.mrf.mxu0 }
  0xa9   :  { %v206_v50 = vmul.f32 1.442695, %v175_v45  ;;  %v606_v53 = vpop.eup %605  ;;  %v194_v63 = vmul.f32 1.442695, %v169_v52  ;;  %v125_v28 = vadd.f32 %v807_v24, %v124_v59 }
  0xaa   :  { %v821_v57 = vadd.f32 1.0, %v606_v53 }
  0xab   :  { %607 = vpow2.f32 %v206_v50  ;;  %v164_v43 = vsub.f32 0.0, %v125_v28 }
  0xac   :  { %v142_v58 = vpop.f32.mrf.mxu2  ;;  %609 = vrcp.f32 %v821_v57  ;;  %vm425_vm6 = vweird.f32 %v821_v57 }
  0xad   :  { %v143_v62 = vadd.f32 %v807_v24, %v142_v58  ;;  %611 = vrcp.f32 %v819_v54 }
  0xae   :  { %613 = vpow2.f32 %v188_v55  ;;  %v184_v55 = vmul.f32 1.442695, %v164_v43 }
  0xaf   :  { %v170_v0 = vsub.f32 0.0, %v143_v62  ;;  %615 = vrcp.f32 %v823_v60 }
  0xb0   :  { %617 = vpow2.f32 %v194_v63  ;;  %v127_v13 = vpop.f32.mrf.mxu0  ;;  %v431_v63 = vand.u32 2147483648, %v821_v57 }
  0xb1   :  { %v196_v3 = vmul.f32 1.442695, %v170_v0  ;;  %v608_v4 = vpop.eup %607  ;;  %v128_v25 = vadd.f32 %v807_v24, %v127_v13  ;;  %v417_v13 = vand.u32 2147483648, %v823_v60 }
  0xb2   :  { %v829_v5 = vpop.eup %609  ;;  %v832_v7 = vadd.f32 1.0, %v608_v4 }
  0xb3   :  { %619 = vpow2.f32 %v196_v3  ;;  %v834_v9 = vpop.eup %611  ;;  %v421_v16 = vmul.f32 %v829_v5, %v821_v57  ;;  %v165_v41 = vsub.f32 0.0, %v128_v25  ;;  %vm426_vm4 = vweird.f32 %v829_v5 }
  0xb4   :  { %621 = vpow2.f32 %v190_v1  ;;  %v145_v8 = vpop.f32.mrf.mxu2  ;;  %v614_v12 = vpop.eup %613  ;;  %v393_v19 = vmul.f32 %v834_v9, %v819_v54  ;;  %v445_v47 = vand.u32 2147483648, %v832_v7  ;;  %v443_v52 = vand.u32 2147483647, %v832_v7  ;;  %vm892_vm8 = vmor %vm425_vm6, %vm426_vm4 }
  0xb5   :  { %623 = vpow2.f32 %v192_v2  ;;  %v146_v11 = vadd.f32 %v807_v24, %v145_v8  ;;  %v839_v14 = vpop.eup %615  ;;  %v422_v32 = vsub.f32 1.0, %v421_v16  ;;  %v861_v38 = vadd.f32 1.0, %v614_v12 }
  0xb6   :  { %625 = vrcp.f32 %v832_v7  ;;  %v618_v17 = vpop.eup %617  ;;  %v407_v29 = vmul.f32 %v839_v14, %v823_v60  ;;  %v394_v37 = vsub.f32 1.0, %v393_v19  ;;  %v163_v24 = vsub.f32 0.0, %v122_v31 }
  0xb7   :  { %v171_v15 = vsub.f32 0.0, %v146_v11  ;;  %v859_v36 = vadd.f32 1.0, %v618_v17  ;;  %v423_v46 = vmul.f32 %v829_v5, %v422_v32  ;;  %v186_v50 = vmul.f32 1.442695, %v165_v41 }
  0xb8   :  { %v408_v44 = vsub.f32 1.0, %v407_v29  ;;  %v395_v48 = vmul.f32 %v834_v9, %v394_v37  ;;  %vm439_vm3 = vweird.f32 %v832_v7  ;;  %v446_v62 = vor.u32 1.1754944e-38, %v445_v47 }
  0xb9   :  { %v620_v21 = vpop.eup %619  ;;  %v198_v23 = vmul.f32 1.442695, %v171_v15  ;;  %v424_v59 = vadd.f32 %v829_v5, %v423_v46  ;;  %vm444_vm7 = vcmp.eq.f32.partialorder %v443_v52, 8.507059e+37  ;;  %v429_v1 = vand.u32 2147483647, %v821_v57 }
  0xba   :  { %v622_v26 = vpop.eup %621  ;;  %v846_v27 = vadd.f32 1.0, %v620_v21  ;;  %v409_v56 = vmul.f32 %v839_v14, %v408_v44  ;;  %vm398_vm9 = vweird.f32 %v834_v9  ;;  %vm412_vm10 = vweird.f32 %v839_v14 }
  0xbb   :  { %v624_v30 = vpop.eup %623  ;;  %627 = vpow2.f32 %v198_v23  ;;  %v869_v20 = vadd.f32 1.0, %v622_v26  ;;  %v182_v11 = vmul.f32 1.442695, %v163_v24  ;;  %v432_v12 = vor.u32 1.1754944e-38, %v431_v63  ;;  %vm913_vm13 = vmor %vm411_vm12, %vm412_vm10 }
  0xbc   :  { %v626_v33 = vpop.eup %625  ;;  %v866_v39 = vadd.f32 1.0, %v624_v30  ;;  %629 = vrcp.f32 %v846_v27  ;;  %v410_v57 = vadd.f32 %v839_v14, %v409_v56  ;;  %vm430_vm11 = vcmp.eq.f32.partialorder %v429_v1, 8.507059e+37  ;;  %vm930_vm15 = vmor %vm397_vm14, %vm398_vm9 }
  0xbd   :  { %v435_v42 = vmul.f32 %v626_v33, %v832_v7  ;;  %631 = vrcp.f32 %v859_v36  ;;  %vm440_vm2 = vweird.f32 %v626_v33  ;;  %v428_v7 = vsel %vm892_vm8, %v829_v5, %v424_v59 }
  0xbe   :  { %633 = vrcp.f32 %v866_v39  ;;  %vm441_vm5 = vmor %vm439_vm3, %vm440_vm2  ;;  %v415_v15 = vand.u32 2147483647, %v823_v60  ;;  %v396_v5 = vadd.f32 %v834_v9, %v395_v48  ;;  %v433_v17 = vsel %vm430_vm11, %v432_v12, %v428_v7 }
  0xbf   :  { %v436_v45 = vsub.f32 1.0, %v435_v42  ;;  %v414_v60 = vsel %vm913_vm13, %v839_v14, %v410_v57  ;;  %v418_v26 = vor.u32 1.1754944e-38, %v417_v13  ;;  %v401_v29 = vand.u32 2147483647, %v819_v54 }
  0xc0   :  { %v404_v30 = vor.u32 1.1754944e-38, %v403_v6  ;;  %vm416_vm0 = vcmp.eq.f32.partialorder %v415_v15, 8.507059e+37  ;;  %v400_v14 = vsel %vm930_vm15, %v834_v9, %v396_v5  ;;  %v160_v24 = vsub.f32 0.0, %v855_v34 }
  0xc1   :  { %v628_v49 = vpop.eup %627  ;;  %v437_v51 = vmul.f32 %v626_v33, %v436_v45  ;;  %vm402_vm3 = vcmp.eq.f32.partialorder %v401_v29, 8.507059e+37  ;;  %vm369_vm8 = vweird.f32 %v846_v27  ;;  %v373_v59 = vand.u32 2147483647, %v846_v27 }
  0xc2   :  { %v877_v53 = vadd.f32 1.0, %v628_v49  ;;  %v883_v61 = vpop.eup %629  ;;  %v405_v48 = vsel %vm402_vm3, %v404_v30, %v400_v14  ;;  %vm355_vm12 = vweird.f32 %v859_v36 }
  0xc3   :  { %v438_v58 = vadd.f32 %v626_v33, %v437_v51  ;;  %v889_v2 = vpop.eup %631  ;;  %v365_v8 = vmul.f32 %v883_v61, %v846_v27  ;;  %vm374_vm11 = vcmp.eq.f32.partialorder %v373_v59, 8.507059e+37 }
  0xc4   :  { %635 = vrcp.f32 %v877_v53  ;;  %v906_v10 = vpop.eup %633  ;;  %v351_v19 = vmul.f32 %v889_v2, %v859_v36  ;;  %v389_v41 = vand.u32 2147483648, %v877_v53  ;;  %v387_v43 = vand.u32 2147483647, %v877_v53 }
  0xc5   :  { %637 = vpow2.f32 %v186_v50  ;;  %v442_v0 = vsel %vm441_vm5, %v626_v33, %v438_v58  ;;  %v366_v23 = vsub.f32 1.0, %v365_v8  ;;  %v337_v32 = vmul.f32 %v906_v10, %v866_v39 }
  0xc6   :  { %639 = vrcp.f32 %v869_v20  ;;  %v447_v3 = vsel %vm444_vm7, %v446_v62, %v442_v0  ;;  %v352_v42 = vsub.f32 1.0, %v351_v19  ;;  %vm383_vm4 = vweird.f32 %v877_v53 }
  0xc7   :  { %574 = vmatpush.xpose.msk.msra.mxu1 %vm451_vm1, %v447_v3  ;;  %641 = vpow2.f32 %v184_v55  ;;  %v367_v44 = vmul.f32 %v883_v61, %v366_v23  ;;  %v390_v51 = vor.u32 1.1754944e-38, %v389_v41  ;;  %vm388_vm6 = vcmp.eq.f32.partialorder %v387_v43, 8.507059e+37 }
  0xc8   :  { %643 = vrcp.f32 %v861_v38  ;;  %v353_v34 = vmul.f32 %v889_v2, %v352_v42  ;;  %vm370_vm7 = vweird.f32 %v883_v61  ;;  %v176_v58 = vmul.f32 1.442695, %v160_v24 }
  0xc9   :  { %645 = vpow2.f32 %v863_v40  ;;  %v419_v40 = vsel %vm416_vm0, %v418_v26, %v414_v60  ;;  %v368_v55 = vadd.f32 %v883_v61, %v367_v44  ;;  %vm967_vm9 = vmor %vm369_vm8, %vm370_vm7  ;;  %vm356_vm10 = vweird.f32 %v889_v2 }
  0xca   :  { %v636_v16 = vpop.eup %635  ;;  %647 = vpow2.f32 %v182_v11  ;;  %v361_v11 = vand.u32 2147483648, %v859_v36  ;;  %vm990_vm13 = vmor %vm355_vm12, %vm356_vm10  ;;  %vm342_vm14 = vweird.f32 %v906_v10  ;;  %v347_v60 = vand.u32 2147483648, %v866_v39 }
  0xcb   :  { %v638_v21 = vpop.eup %637  ;;  %575 = vmatpush.xpose.msk.msra.mxu1 %vm451_vm1, %v433_v17  ;;  %v379_v22 = vmul.f32 %v636_v16, %v877_v53  ;;  %vm384_vm2 = vweird.f32 %v636_v16  ;;  %649 = vpow2.f32 %v857_v35  ;;  %v338_v35 = vsub.f32 1.0, %v337_v32 }
  0xcc   :  { %v926_v25 = vpop.eup %639  ;;  %v940_v37 = vadd.f32 1.0, %v638_v21  ;;  %vm385_vm5 = vmor %vm383_vm4, %vm384_vm2  ;;  %v375_v53 = vand.u32 2147483648, %v846_v27  ;;  %v372_v3 = vsel %vm967_vm9, %v883_v61, %v368_v55  ;;  %v354_v27 = vadd.f32 %v889_v2, %v353_v34 }
  0xcd   :  { %v380_v31 = vsub.f32 1.0, %v379_v22  ;;  %v642_v33 = vpop.eup %641  ;;  %v323_v45 = vmul.f32 %v926_v25, %v869_v20  ;;  %v339_v4 = vmul.f32 %v906_v10, %v338_v35  ;;  %v359_v61 = vand.u32 2147483647, %v859_v36 }
  0xce   :  { %v946_v9 = vpop.eup %643  ;;  %v952_v47 = vadd.f32 1.0, %v642_v33  ;;  %651 = vrcp.f32 %v940_v37  ;;  %v376_v8 = vor.u32 1.1754944e-38, %v375_v53  ;;  %v358_v5 = vsel %vm990_vm13, %v889_v2, %v354_v27 }
  0xcf   :  { %576 = vmatpush.xpose.msk.msra.mxu1 %vm451_vm1, %v419_v40  ;;  %v381_v54 = vmul.f32 %v636_v16, %v380_v31  ;;  %v646_v46 = vpop.eup %645  ;;  %v324_v1 = vsub.f32 1.0, %v323_v45  ;;  %v309_v6 = vmul.f32 %v946_v9, %v861_v38  ;;  %v340_v36 = vadd.f32 %v906_v10, %v339_v4 }
  0xd0   :  { %v648_v50 = vpop.eup %647  ;;  %653 = vrcp.f32 %v952_v47  ;;  %v982_v57 = vadd.f32 1.0, %v646_v46  ;;  %v377_v12 = vsel %vm374_vm11, %v376_v8, %v372_v3  ;;  %v362_v21 = vor.u32 1.1754944e-38, %v361_v11 }
  0xd1   :  { %v382_v49 = vadd.f32 %v636_v16, %v381_v54  ;;  %v650_v62 = vpop.eup %649  ;;  %v964_v63 = vadd.f32 1.0, %v648_v50  ;;  %655 = vpow2.f32 %v176_v58  ;;  %v325_v15 = vmul.f32 %v926_v25, %v324_v1 }
  0xd2   :  { %v1005_v19 = vadd.f32 1.0, %v650_v62  ;;  %vm360_vm15 = vcmp.eq.f32.partialorder %v359_v61, 8.507059e+37  ;;  %vm341_vm0 = vweird.f32 %v866_v39  ;;  %v345_v2 = vand.u32 2147483647, %v866_v39 }
  0xd3   :  { %577 = vmatpush.xpose.msk.msra.mxu1 %vm451_vm1, %v405_v48  ;;  %v386_v52 = vsel %vm385_vm5, %v636_v16, %v382_v49  ;;  %657 = vrcp.f32 %v964_v63  ;;  %v310_v16 = vsub.f32 1.0, %v309_v6  ;;  %v363_v22 = vsel %vm360_vm15, %v362_v21, %v358_v5  ;;  %vm1013_vm2 = vmor %vm341_vm0, %vm342_vm14 }
  0xd4   :  { %v391_v56 = vsel %vm388_vm6, %v390_v51, %v386_v52  ;;  %v980_v7 = vpop.eup %651  ;;  %659 = vrcp.f32 %v982_v57  ;;  %v326_v26 = vadd.f32 %v926_v25, %v325_v15  ;;  %vm328_vm3 = vweird.f32 %v926_v25 }
  0xd5   :  { %v295_v17 = vmul.f32 %v980_v7, %v940_v37  ;;  %v344_v29 = vsel %vm1013_vm2, %v906_v10, %v340_v36  ;;  %v311_v39 = vmul.f32 %v946_v9, %v310_v16  ;;  %661 = vrcp.f32 %v1005_v19 }
  0xd6   :  { %v1003_v18 = vpop.eup %653  ;;  %v348_v32 = vor.u32 1.1754944e-38, %v347_v60  ;;  %vm327_vm4 = vweird.f32 %v869_v20  ;;  %v333_v33 = vand.u32 2147483648, %v869_v20  ;;  %vm346_vm5 = vcmp.eq.f32.partialorder %v345_v2, 8.507059e+37 }
  0xd7   :  { %578 = vmatpush.xpose.msk.msra.mxu1 %vm451_vm1, %v391_v56  ;;  %v656_v28 = vpop.eup %655  ;;  %v296_v30 = vsub.f32 1.0, %v295_v17  ;;  %v281_v14 = vmul.f32 %v1003_v18, %v952_v47  ;;  %vm1031_vm6 = vmor %vm327_vm4, %vm328_vm3  ;;  %v331_v10 = vand.u32 2147483647, %v869_v20  ;;  %vm314_vm7 = vweird.f32 %v946_v9 }
  0xd8   :  { %v1038_v42 = vadd.f32 1.0, %v656_v28  ;;  %v349_v54 = vsel %vm346_vm5, %v348_v32, %v344_v29  ;;  %v330_v43 = vsel %vm1031_vm6, %v926_v25, %v326_v26  ;;  %v312_v44 = vadd.f32 %v946_v9, %v311_v39 }
  0xd9   :  { %v1026_v31 = vpop.eup %657  ;;  %v297_v24 = vmul.f32 %v980_v7, %v296_v30  ;;  %v282_v45 = vsub.f32 1.0, %v281_v14  ;;  %v334_v46 = vor.u32 1.1754944e-38, %v333_v33  ;;  %vm313_vm8 = vweird.f32 %v861_v38 }
  0xda   :  { %v1036_v41 = vpop.eup %659  ;;  %v267_v20 = vmul.f32 %v1026_v31, %v964_v63  ;;  %v317_v48 = vand.u32 2147483647, %v861_v38  ;;  %v319_v49 = vand.u32 2147483648, %v861_v38  ;;  %vm332_vm9 = vcmp.eq.f32.partialorder %v331_v10, 8.507059e+37  ;;  %vm1061_vm12 = vmor %vm313_vm8, %vm314_vm7 }
  0xdb   :  { %579 = vmatpush.xpose.msk.msra.mxu1 %vm451_vm1, %v377_v12  ;;  %vm299_vm10 = vweird.f32 %v940_v37  ;;  %vm300_vm11 = vweird.f32 %v980_v7  ;;  %v253_v25 = vmul.f32 %v1036_v41, %v982_v57  ;;  %v1056_v50 = vpop.eup %661  ;;  %663 = vrcp.f32 %v1038_v42 }
  0xdc   :  { %v335_v51 = vsel %vm332_vm9, %v334_v46, %v330_v43  ;;  %v303_v38 = vand.u32 2147483647, %v940_v37  ;;  %v305_v35 = vand.u32 2147483648, %v940_v37  ;;  %v316_v52 = vsel %vm1061_vm12, %v946_v9, %v312_v44  ;;  %vm1077_vm14 = vmor %vm299_vm10, %vm300_vm11 }
  0xdd   :  { %v298_v55 = vadd.f32 %v980_v7, %v297_v24  ;;  %v283_v56 = vmul.f32 %v1003_v18, %v282_v45  ;;  %v268_v53 = vsub.f32 1.0, %v267_v20  ;;  %vm318_vm13 = vcmp.eq.f32.partialorder %v317_v48, 8.507059e+37  ;;  %v448_v20 = vld [vmem:[%s1155_s3] sm:$0x1]  ;;  %s695_s3 = smov [#allocation3]  }
  0xde   :  { %v320_v58 = vor.u32 1.1754944e-38, %v319_v49  ;;  %vm285_vm15 = vweird.f32 %v952_v47  ;;  %vm286_vm0 = vweird.f32 %v1003_v18  ;;  %v254_v9 = vsub.f32 1.0, %v253_v25  ;;  %s547_s10 = sshll.u32 %s695_s3, 4  ;;  %s548_s10 = int_to_ptr.vmem [resolvable:$true] %s547_s10 }
  0xdf   :  { %580 = vmatpush.xpose.msk.msra.mxu1 %vm451_vm1, %v363_v22  ;;  %v239_v62 = vmul.f32 %v1056_v50, %v1005_v19  ;;  %vm304_vm2 = vcmp.eq.f32.partialorder %v303_v38, 8.507059e+37  ;;  %v306_v1 = vor.u32 1.1754944e-38, %v305_v35  ;;  %v291_v3 = vand.u32 2147483648, %v952_v47  ;;  %vm1093_vm3 = vmor %vm285_vm15, %vm286_vm0 }
  0xe0   :  { %v321_v0 = vsel %vm318_vm13, %v320_v58, %v316_v52  ;;  %v302_v37 = vsel %vm1077_vm14, %v980_v7, %v298_v55  ;;  %v284_v27 = vadd.f32 %v1003_v18, %v283_v56  ;;  %v289_v4 = vand.u32 2147483647, %v952_v47 }
  0xe1   :  { %v269_v6 = vmul.f32 %v1026_v31, %v268_v53  ;;  %v664_v8 = vpop.eup %663  ;;  %vm271_vm4 = vweird.f32 %v964_v63  ;;  %vm272_vm5 = vweird.f32 %v1026_v31  ;;  %v255_v61 = vmul.f32 %v1036_v41, %v254_v9 }
  0xe2   :  { %v240_v12 = vsub.f32 1.0, %v239_v62  ;;  %v307_v13 = vsel %vm304_vm2, %v306_v1, %v302_v37  ;;  %v292_v7 = vor.u32 1.1754944e-38, %v291_v3  ;;  %v275_v15 = vand.u32 2147483647, %v964_v63  ;;  %vm1108_vm7 = vmor %vm271_vm4, %vm272_vm5 }
  0xe3   :  { %581 = vmatpush.xpose.msk.msra.mxu1 %vm451_vm1, %v349_v54  ;;  %v277_v47 = vand.u32 2147483648, %v964_v63  ;;  %v288_v5 = vsel %vm1093_vm3, %v1003_v18, %v284_v27  ;;  %vm290_vm6 = vcmp.eq.f32.partialorder %v289_v4, 8.507059e+37  ;;  %v270_v36 = vadd.f32 %v1026_v31, %v269_v6 }
  0xe4   :  { %v225_v16 = vmul.f32 %v664_v8, %v1038_v42  ;;  %v256_v21 = vadd.f32 %v1036_v41, %v255_v61  ;;  %vm257_vm8 = vweird.f32 %v982_v57  ;;  %vm258_vm9 = vweird.f32 %v1036_v41 }
  0xe5   :  { %v293_v63 = vsel %vm290_vm6, %v292_v7, %v288_v5  ;;  %vm276_vm10 = vcmp.eq.f32.partialorder %v275_v15, 8.507059e+37  ;;  %v278_v60 = vor.u32 1.1754944e-38, %v277_v47  ;;  %v263_v18 = vand.u32 2147483648, %v982_v57  ;;  %vm1122_vm11 = vmor %vm257_vm8, %vm258_vm9 }
  0xe6   :  { %v274_v2 = vsel %vm1108_vm7, %v1026_v31, %v270_v36  ;;  %v261_v22 = vand.u32 2147483647, %v982_v57  ;;  %v241_v23 = vmul.f32 %v1056_v50, %v240_v12  ;;  %v226_v26 = vsub.f32 1.0, %v225_v16 }
  0xe7   :  { %582 = vmatpush.xpose.msk.msra.mxu1 %vm451_vm1, %v335_v51  ;;  %vm243_vm12 = vweird.f32 %v1005_v19  ;;  %vm244_vm13 = vweird.f32 %v1056_v50  ;;  %v279_v29 = vsel %vm276_vm10, %v278_v60, %v274_v2  ;;  %v264_v39 = vor.u32 1.1754944e-38, %v263_v18 }
  0xe8   :  { %v247_v30 = vand.u32 2147483647, %v1005_v19  ;;  %v249_v14 = vand.u32 2147483648, %v1005_v19  ;;  %v260_v57 = vsel %vm1122_vm11, %v1036_v41, %v256_v21  ;;  %vm262_vm14 = vcmp.eq.f32.partialorder %v261_v22, 8.507059e+37  ;;  %vm245_vm15 = vmor %vm243_vm12, %vm244_vm13 }
  0xe9   :  { %v242_v31 = vadd.f32 %v1056_v50, %v241_v23  ;;  %v227_v32 = vmul.f32 %v664_v8, %v226_v26  ;;  %vm229_vm0 = vweird.f32 %v1038_v42  ;;  %vm230_vm2 = vweird.f32 %v664_v8 }
  0xea   :  { %v265_v33 = vsel %vm262_vm14, %v264_v39, %v260_v57  ;;  %v250_v40 = vor.u32 1.1754944e-38, %v249_v14  ;;  %v235_v10 = vand.u32 2147483648, %v1038_v42  ;;  %vm248_vm3 = vcmp.eq.f32.partialorder %v247_v30, 8.507059e+37  ;;  %vm231_vm4 = vmor %vm229_vm0, %vm230_vm2 }
  0xeb   :  { %583 = vmatpush.xpose.msk.msra.mxu1 %vm451_vm1, %v321_v0  ;;  %v246_v19 = vsel %vm245_vm15, %v1056_v50, %v242_v31  ;;  %v228_v54 = vadd.f32 %v664_v8, %v227_v32  ;;  %v233_v41 = vand.u32 2147483647, %v1038_v42  ;;  %v450_v42 = vstv %s1156_s4  ;;  %s549_s4 = sshll.u32 %s1157_s5, 4  ;;  %s550_s4 = int_to_ptr.hbm [resolvable:$true] %s549_s4 }
  0xec   :  { %v251_v43 = vsel %vm248_vm3, %v250_v40, %v246_v19  ;;  %v236_v44 = vor.u32 1.1754944e-38, %v235_v10 }
  0xed   :  { %v232_v24 = vsel %vm231_vm4, %v664_v8, %v228_v54  ;;  %vm234_vm5 = vcmp.eq.f32.partialorder %v233_v41, 8.507059e+37 }
  0xee   :  { %v237_v45 = vsel %vm234_vm5, %v236_v44, %v232_v24 }
  0xef   :  { %584 = vmatpush.xpose.msk.msra.mxu1 %vm451_vm1, %v307_v13 }
  0xf3   :  { %585 = vmatpush.xpose.msk.msra.mxu1 %vm451_vm1, %v293_v63 }
  0xf7   :  { %586 = vmatpush.xpose.msk.msra.mxu1 %vm451_vm1, %v279_v29 }
  0xfb   :  { %587 = vmatpush.xpose.msk.msra.mxu1 %vm451_vm1, %v265_v33 }
  0xff   :  { %588 = vmatpush.xpose.msk.msra.mxu1 %vm451_vm1, %v251_v43 }
 0x103   :  { %589 = vmatpush.xpose.msk.msra.mxu1 %vm451_vm1, %v237_v45 }
 0x106   :  { %590 = vmatmul.msk.f32.vlgmr.msra.gmra.mxu1 %vm451_vm1, %v448_v20 }
 0x183   :  { %v520_v46 = vpop.f32.mrf.mxu1 }
 0x184   :  { %v521_v48 = vadd.f32 %v520_v46, %v450_v42 }
 0x186   :  { %v523_v49 = vsub.f32 0.0, %v521_v48 }
 0x188   :  { %v524_v25 = vmul.f32 1.442695, %v523_v49 }
 0x18a   :  { %665 = vpow2.f32 %v524_v25 }
 0x190   :  { %v666_v50 = vpop.eup %665 }
 0x191   :  { %v526_v51 = vadd.f32 1.0, %v666_v50 }
 0x193   :  { %667 = vrcp.f32 %v526_v51  ;;  %v538_v52 = vand.u32 2147483648, %v526_v51  ;;  %v536_v56 = vand.u32 2147483647, %v526_v51  ;;  %vm532_vm1 = vweird.f32 %v526_v51 }
 0x195   :  { %v539_v58 = vor.u32 1.1754944e-38, %v538_v52  ;;  %vm537_vm8 = vcmp.eq.f32.partialorder %v536_v56, 8.507059e+37 }
 0x199   :  { %v668_v34 = vpop.eup %667 }
 0x19a   :  { %v528_v38 = vmul.f32 %v668_v34, %v526_v51  ;;  %vm533_vm6 = vweird.f32 %v668_v34 }
 0x19b   :  { %vm534_vm7 = vmor %vm532_vm1, %vm533_vm6 }
 0x19c   :  { %v529_v35 = vsub.f32 1.0, %v528_v38 }
 0x19e   :  { %v530_v55 = vmul.f32 %v668_v34, %v529_v35 }
 0x1a0   :  { %v531_v53 = vadd.f32 %v668_v34, %v530_v55 }
 0x1a2   :  { %v535_v59 = vsel %vm534_vm7, %v668_v34, %v531_v53 }
 0x1a3   :  { %v540_v9 = vsel %vm537_vm8, %v539_v58, %v535_v59 }
 0x1a4   :  { %541 = vst [vmem:[#allocation3] sm:$0x1] %v540_v9 }
 0x1a5   :  { %552 = dma.vmem_to_hbm [thread:$0]  %s548_s10, 16, %s550_s4, [#allocation4]  }
 0x1a6   :  { %693 = dma.done.wait [#allocation4], 16  }
 0x1a7   :  { %694 = vsyncadd [#allocation4], 4294967280 }
 0x1a8   :  { %557 = vsyncpa [#allocation4], 1 }

</bundles_post_ra>
